<compile_context>
chip_gen: v7x
topology: tpu7x:2x2x1
jax: 0.10.0
libtpu: 0.0.40
codegen_flags: <defaults>
</compile_context>

<pallas_src>
import functools

import jax
import jax.numpy as jnp
from jax.experimental import pallas as pl
from jax.experimental.pallas import tpu as pltpu


def _round_up(x, m):
    return (x + m - 1) // m * m


def _fit_tile(total, requested, align):
    """Pick a tile size <= requested that covers `total` with minimal padding."""
    padded = _round_up(total, align)
    if padded <= requested:
        return padded
    ntiles = -(-padded // requested)
    return _round_up(-(-padded // ntiles), align)


def _coco_kernel_noacc(feat_ref, cent_ref, invf_ref, invc_ref, out_ref, *, alpha):
    # feat_ref: (bm, Dp)  features              (native dtype)
    # cent_ref: (Dp, bc)  pre-transposed centers (native dtype)
    # invf_ref: (bm, 1)   precomputed 1/||feat||   (f32)
    # invc_ref: (1,  bc)  precomputed 1/||center|| (f32)
    # out_ref:  (bm, bc)  logits tile
    acc = jnp.dot(feat_ref[...], cent_ref[...], preferred_element_type=jnp.float32)
    row_scale = jnp.float32(alpha) * invf_ref[...]          # (bm, 1)
    col_scale = invc_ref[...]                                # (1, bc)
    out_ref[...] = (acc * row_scale * col_scale).astype(out_ref.dtype)


def _coco_kernel_acc(feat_ref, cent_ref, invf_ref, invc_ref, out_ref, acc_ref, *, alpha):
    # Same as above but with a K reduction axis (grid axis 2) and an f32
    # VMEM accumulator; feat_ref is (bm, bk), cent_ref is (bk, bc).
    k = pl.program_id(2)

    @pl.when(k == 0)
    def _init():
        acc_ref[...] = jnp.zeros_like(acc_ref)

    acc_ref[...] += jnp.dot(feat_ref[...], cent_ref[...],
                            preferred_element_type=jnp.float32)

    @pl.when(k == pl.num_programs(2) - 1)
    def _finish():
        row_scale = jnp.float32(alpha) * invf_ref[...]       # (bm, 1)
        col_scale = invc_ref[...]                             # (1, bc)
        out_ref[...] = (acc_ref[...] * row_scale * col_scale).astype(out_ref.dtype)


def coco_logit(feat, centers, alpha=6.25, *, bm=512, bc=1024, bk=1024,
               vmem_budget_bytes=40 * 1024 * 1024):
    """COCOLogit forward.  feat: (B, D), centers: (C, D) -> logits (B, C)."""
    B, D = feat.shape
    C, Dc = centers.shape
    assert D == Dc, "feat_dim mismatch between feat and centers"

    out_dtype = feat.dtype
    in_item = jnp.dtype(feat.dtype).itemsize
    out_item = jnp.dtype(out_dtype).itemsize

    # One-time precompute outside the kernel (the review's biggest wins):
    #   * inverse feature / center L2 norms in f32 (single XLA pass each,
    #     instead of re-reducing inside the kernel per C-tile and K-step).
    #   * centers transposed to (D, C): canonical MXU (M,K)@(K,N), lane-dense
    #     along C, amortized weight-side work.
    inv_f = jax.lax.rsqrt(jnp.sum(feat.astype(jnp.float32) ** 2, axis=-1))[:, None]    # (B, 1)
    inv_c = jax.lax.rsqrt(jnp.sum(centers.astype(jnp.float32) ** 2, axis=-1))[None, :]  # (1, C)
    centers_t = centers.T                                                               # (D, C)

    # Padding-aware tile selection (balanced against tile counts).
    bm = _fit_tile(B, bm, 8)
    bc = _fit_tile(C, bc, 128)
    Dp = _round_up(D, 128)

    def footprint(bk_, with_acc):
        f = 2 * bm * bk_ * in_item          # feat tiles (double-buffered)
        f += 2 * bk_ * bc * in_item         # centers tiles
        f += 2 * bm * bc * out_item         # output tiles
        f += 2 * bm * 128 * 4               # inv_f (lane-padded)
        f += 2 * 8 * max(bc, 128) * 4       # inv_c (sublane-padded)
        if with_acc:
            f += bm * bc * 4                # f32 accumulator scratch
        return f

    use_acc = footprint(Dp, False) > vmem_budget_bytes
    if not use_acc:
        bk = Dp
    else:
        bk = min(_round_up(min(bk, Dp), 128), Dp)
        while bk > 128 and footprint(bk, True) > vmem_budget_bytes:
            bk = _round_up(bk // 2, 128)
        while bc > 256 and footprint(bk, True) > vmem_budget_bytes:
            bc = _round_up(bc // 2, 128)
        while bm > 256 and footprint(bk, True) > vmem_budget_bytes:
            bm = _round_up(bm // 2, 8)

    Bp = _round_up(B, bm)
    Cp = _round_up(C, bc)
    Dpad = _round_up(D, bk)

    # Zero padding is neutral for the contraction; padded inverse norms are
    # set to 0 so padded rows/cols produce 0 (no NaNs written to HBM), and are
    # sliced off at the end anyway.
    feat_p = feat if (Bp == B and Dpad == D) else jnp.pad(feat, ((0, Bp - B), (0, Dpad - D)))
    cent_p = centers_t if (Cp == C and Dpad == D) else jnp.pad(
        centers_t, ((0, Dpad - D), (0, Cp - C)))
    invf_p = inv_f if Bp == B else jnp.pad(inv_f, ((0, Bp - B), (0, 0)))
    invc_p = inv_c if Cp == C else jnp.pad(inv_c, ((0, 0), (0, Cp - C)))

    if not use_acc:
        grid = (Bp // bm, Cp // bc)
        kernel = functools.partial(_coco_kernel_noacc, alpha=float(alpha))
        grid_spec = pltpu.PrefetchScalarGridSpec(
            num_scalar_prefetch=0,
            grid=grid,
            in_specs=[
                pl.BlockSpec((bm, bk), lambda i, j: (i, 0)),   # feat
                pl.BlockSpec((bk, bc), lambda i, j: (0, j)),   # centers^T
                pl.BlockSpec((bm, 1), lambda i, j: (i, 0)),    # 1/||feat||
                pl.BlockSpec((1, bc), lambda i, j: (0, j)),    # 1/||center||
            ],
            out_specs=pl.BlockSpec((bm, bc), lambda i, j: (i, j)),
            scratch_shapes=[],
        )
        dim_sem = ("parallel", "parallel")
    else:
        grid = (Bp // bm, Cp // bc, Dpad // bk)
        kernel = functools.partial(_coco_kernel_acc, alpha=float(alpha))
        grid_spec = pltpu.PrefetchScalarGridSpec(
            num_scalar_prefetch=0,
            grid=grid,
            in_specs=[
                pl.BlockSpec((bm, bk), lambda i, j, k: (i, k)),   # feat slab
                pl.BlockSpec((bk, bc), lambda i, j, k: (k, j)),   # centers^T slab
                pl.BlockSpec((bm, 1), lambda i, j, k: (i, 0)),    # 1/||feat||
                pl.BlockSpec((1, bc), lambda i, j, k: (0, j)),    # 1/||center||
            ],
            out_specs=pl.BlockSpec((bm, bc), lambda i, j, k: (i, j)),
            scratch_shapes=[pltpu.VMEM((bm, bc), jnp.float32)],
        )
        dim_sem = ("parallel", "parallel", "arbitrary")

    out = pl.pallas_call(
        kernel,
        out_shape=jax.ShapeDtypeStruct((Bp, Cp), out_dtype),
        grid_spec=grid_spec,
        compiler_params=pltpu.CompilerParams(
            dimension_semantics=dim_sem,
            # 48 MiB: above the 40 MiB tile budget, well under v7x's 64 MiB VMEM.
            vmem_limit_bytes=48 * 1024 * 1024,
        ),
    )(feat_p, cent_p, invf_p, invc_p)

    return out[:B, :C]


def coco_logit_ref(feat, centers, alpha=6.25):
    """Pure-JAX reference matching the PyTorch forward."""
    norms = jnp.linalg.norm(feat, axis=-1, keepdims=True)
    snfeat = alpha * (feat / norms)
    norms_c = jnp.linalg.norm(centers, axis=-1, keepdims=True)
    ncenters = centers / norms_c
    return snfeat @ ncenters.T


if __name__ == "__main__":
    # Small shapes consistent with the module: feat_dim=32, num_classes=16, batch=8.
    feat_dim = 32
    num_classes = 16
    batch = 8
    alpha = 6.25

    key = jax.random.PRNGKey(0)
    k_feat, k_centers = jax.random.split(key)

    # Deterministic synthetic parameter init (stand-in for torch.randn centers).
    centers = jax.random.normal(k_centers, (num_classes, feat_dim), dtype=jnp.float32)
    feat = jax.random.normal(k_feat, (batch, feat_dim), dtype=jnp.float32)

    logits = coco_logit(feat, centers, alpha=alpha)
    logits = jax.block_until_ready(logits)

    ref = coco_logit_ref(feat, centers, alpha=alpha)
    assert logits.shape == (batch, num_classes)
    assert jnp.allclose(logits, ref, atol=1e-4, rtol=1e-4), (
        f"max abs err {jnp.max(jnp.abs(logits - ref))}"
    )

    print("KERNEL_OK")
</pallas_src>

<mosaic_0001>
module attributes {stable_mosaic.version = 11 : i64} {
  func.func @_coco_kernel_noacc(%arg0: i32, %arg1: i32, %arg2: memref<8x128xf32, #tpu.memory_space<vmem>>, %arg3: memref<128x128xf32, #tpu.memory_space<vmem>>, %arg4: memref<8x1xf32, #tpu.memory_space<vmem>>, %arg5: memref<1x128xf32, #tpu.memory_space<vmem>>, %arg6: memref<8x128xf32, #tpu.memory_space<vmem>>) attributes {dimension_semantics = [#tpu.dimension_semantics<parallel>, #tpu.dimension_semantics<parallel>], iteration_bounds = array<i64: 1, 1>, scalar_prefetch = 0 : i64, scratch_operands = 0 : i64, tpu.core_type = #tpu.core_type<tc>, window_params = [{transform_indices = @transform_0, window_bounds = array<i64: 8, 128>}, {transform_indices = @transform_1, window_bounds = array<i64: 128, 128>}, {transform_indices = @transform_2, window_bounds = array<i64: 8, 1>}, {transform_indices = @transform_3, window_bounds = array<i64: 1, 128>}, {transform_indices = @transform_4, window_bounds = array<i64: 8, 128>}]} {
    %c0 = arith.constant 0 : index
    %c0_0 = arith.constant 0 : index
    %0 = vector.load %arg2[%c0, %c0_0] : memref<8x128xf32, #tpu.memory_space<vmem>>, vector<8x128xf32>
    %c0_1 = arith.constant 0 : index
    %c0_2 = arith.constant 0 : index
    %1 = vector.load %arg3[%c0_1, %c0_2] : memref<128x128xf32, #tpu.memory_space<vmem>>, vector<128x128xf32>
    %cst = arith.constant dense<0.000000e+00> : vector<8x128xf32>
    %2 = tpu.matmul %0, %1, %cst {dimension_numbers = #tpu.dot_dimension_numbers<[1], [0], [0], [1], [0, 0, 1, 1], [], []>} : vector<8x128xf32>, vector<128x128xf32>, vector<8x128xf32> -> vector<8x128xf32>
    %c0_3 = arith.constant 0 : index
    %c0_4 = arith.constant 0 : index
    %3 = vector.load %arg4[%c0_3, %c0_4] : memref<8x1xf32, #tpu.memory_space<vmem>>, vector<8x1xf32>
    %cst_5 = arith.constant 6.250000e+00 : f32
    %4 = vector.broadcast %cst_5 : f32 to vector<8x1xf32>
    %5 = arith.mulf %4, %3 : vector<8x1xf32>
    %c0_6 = arith.constant 0 : index
    %c0_7 = arith.constant 0 : index
    %6 = vector.load %arg5[%c0_6, %c0_7] : memref<1x128xf32, #tpu.memory_space<vmem>>, vector<1x128xf32>
    %7 = vector.broadcast %5 : vector<8x1xf32> to vector<8x128xf32>
    %8 = arith.mulf %2, %7 : vector<8x128xf32>
    %9 = vector.broadcast %6 : vector<1x128xf32> to vector<8x128xf32>
    %10 = arith.mulf %8, %9 : vector<8x128xf32>
    %c0_8 = arith.constant 0 : index
    %c0_9 = arith.constant 0 : index
    %11 = vector.load %arg6[%c0_8, %c0_9] : memref<8x128xf32, #tpu.memory_space<vmem>>, vector<8x128xf32>
    tpu.vector_store %arg6[%c0_8, %c0_9], %10 {strides = array<i32>} : memref<8x128xf32, #tpu.memory_space<vmem>>, vector<8x128xf32>,
    return
  }
  func.func @transform_0(%arg0: i32, %arg1: i32) -> (i32, i32) {
    %c0_i32 = arith.constant 0 : i32
    %c0_i32_0 = arith.constant 0 : i32
    return %arg0, %c0_i32 : i32, i32
  }
  func.func @transform_1(%arg0: i32, %arg1: i32) -> (i32, i32) {
    %c0_i32 = arith.constant 0 : i32
    %c0_i32_0 = arith.constant 0 : i32
    return %c0_i32, %arg1 : i32, i32
  }
  func.func @transform_2(%arg0: i32, %arg1: i32) -> (i32, i32) {
    %c0_i32 = arith.constant 0 : i32
    %c0_i32_0 = arith.constant 0 : i32
    return %arg0, %c0_i32 : i32, i32
  }
  func.func @transform_3(%arg0: i32, %arg1: i32) -> (i32, i32) {
    %c0_i32 = arith.constant 0 : i32
    %c0_i32_0 = arith.constant 0 : i32
    return %c0_i32, %arg1 : i32, i32
  }
  func.func @transform_4(%arg0: i32, %arg1: i32) -> (i32, i32) {
    %c0_i32 = arith.constant 0 : i32
    return %arg0, %arg1 : i32, i32
  }
}

</mosaic_0001>

<bundles_post_ra>
// kernel: tpu_custom_call.1
= control target key start
LH: loop header
LB: loop body
LE: loop exit
PB: predicated region body
PF: predicated region fallthrough
CT: control target
= control target key end

     0   :  { %9 = vsyncpa [#allocation3], 0  ;;  %s351_s0 = inlined_call_operand.vmem [shape: f32[8,128], index: 0, kind: input, shape index: {}]   ;;  %s352_s1 = inlined_call_operand.hbm [shape: f32[128,128], index: 1, kind: input, shape index: {}]   ;;  %s353_s2 = inlined_call_operand.vmem [shape: f32[8,1], index: 2, kind: input, shape index: {}]   ;;  %s354_s3 = inlined_call_operand.vmem [shape: f32[1,128], index: 3, kind: input, shape index: {}]   ;;  %s355_s4 = inlined_call_operand.hbm [shape: f32[8,128], index: 4, kind: output, shape index: {}]  }
   0x1   :  { %10 = vsyncpa [#allocation4], 0  ;;  %s285_s15 = smov [#allocation2]   ;;  %s237_s19 = scalar_lea.hbm %s352_s1, 2048 }
   0x2   :  { %s18_s16 = sshll.u32 %s285_s15, 4  ;;  %p238_p0 = scmp.ne.s32.totalorder %s352_s1, %s237_s19  ;;  %s19_s16 = int_to_ptr.vmem [resolvable:$true] %s18_s16 }
   0x3   :  { %p241_p1 = scmp.lt.u32.totalorder %s237_s19, %s352_s1 }
   0x5   :  { %p243_p2 = pnand %p241_p1, %p238_p0 }
   0x7   :  { %246 = shalt.err (!%p243_p2)
}
   0x8   :  { %s247_s24 = scalar_lea.vmem %s19_s16, 2048  ;;  %p252_p4 = scmp.lt.s32.totalorder %s19_s16, %s19_s16 }
   0x9   :  { %p248_p3 = scmp.ne.s32.totalorder %s19_s16, %s247_s24  ;;  %p253_p5 = scmp.lt.s32.totalorder %s247_s24, %s247_s24 }
   0xb   :  { %p254_p6 = por %p253_p5, %p252_p4 }
   0xd   :  { %p255_p7 = pnand %p254_p6, %p248_p3 }
   0xf   :  { %258 = shalt.err (!%p255_p7)
}
  0x10   :  { %s286_s25 = smov 128   ;;  %s287_s26 = smov 8  }
  0x11   :  { %24 = dma.hbm_to_vmem [thread:$0]  %s352_s1, 2048, %s19_s16, [#allocation3], %s286_s25, %s286_s25, %s287_s26  }
  0x12   :  { %281 = dma.done.wait [#allocation3], 2048  }
  0x13   :  { %282 = vsyncadd [#allocation3], 4294965248  ;;  %v288_v0 = vmov 0.0|0.0   ;;  %vm289_vm0 = vmmov 0   ;;  %v290_v1 = vmov 0.0   ;;  %v291_v2 = vmov 0  }
  0x14   :  { %204 = vmatprep.subr.bf16.mxu0 %v288_v0  ;;  %201 = vmatprep.mubr.msk.f32.mxu0 %vm289_vm0, %v290_v1  ;;  %v33_v3 = vld [vmem:[#allocation2] sm:$0xff]  ;;  %v34_v4 = vld [vmem:[#allocation2 + $0x8] sm:$0xff]  ;;  %v35_v5 = vld [vmem:[#allocation2 + $0x10] sm:$0xff]  ;;  %s292_s7 = smov [#allocation5]  }
  0x15   :  { %236 = vset.pattern.permute.xlu0 %v291_v2  ;;  %v205_v6 = vpack.c.bf16 %v34_v4, %v33_v3  ;;  %v36_v7 = vld [vmem:[#allocation2 + $0x18] sm:$0xff]  ;;  %v37_v9 = vld [vmem:[#allocation2 + $0x20] sm:$0xff]  ;;  %v38_v10 = vld [vmem:[#allocation2 + $0x28] sm:$0xff]  ;;  %s142_s8 = sshll.u32 %s292_s7, 4  ;;  %s143_s8 = int_to_ptr.vmem [resolvable:$true] %s142_s8 }
  0x16   :  { %v208_v8 = vpack.c.bf16 %v36_v7, %v35_v5  ;;  %v119_v11 = vld [vmem:[%s353_s2] sm:$0xff]  ;;  %v211_v13 = vpack.c.bf16 %v38_v10, %v37_v9  ;;  %v39_v14 = vld [vmem:[#allocation2 + $0x30] sm:$0xff]  ;;  %v40_v15 = vld [vmem:[#allocation2 + $0x38] sm:$0xff]  ;;  %s259_s9 = scalar_lea.vmem %s143_s8, 128  ;;  %p264_p9 = scmp.lt.s32.totalorder %s143_s8, %s143_s8 }
  0x17   :  { %206 = vmatpush3.bf16.msra.mxu0 %v205_v6  ;;  %v120_v12 = vmul.f32 6.25, %v119_v11  ;;  %v214_v16 = vpack.c.bf16 %v40_v15, %v39_v14  ;;  %v41_v17 = vld [vmem:[#allocation2 + $0x40] sm:$0xff]  ;;  %v42_v18 = vld [vmem:[#allocation2 + $0x48] sm:$0xff]  ;;  %v43_v20 = vld [vmem:[#allocation2 + $0x50] sm:$0xff]  ;;  %p260_p8 = scmp.ne.s32.totalorder %s143_s8, %s259_s9  ;;  %p265_p10 = scmp.lt.s32.totalorder %s259_s9, %s259_s9 }
  0x18   :  { %207 = vmatprep.subr.bf16.mxu0 %v288_v0  ;;  %v217_v19 = vpack.c.bf16 %v42_v18, %v41_v17  ;;  %v44_v21 = vld [vmem:[#allocation2 + $0x58] sm:$0xff]  ;;  %v45_v23 = vld [vmem:[#allocation2 + $0x60] sm:$0xff]  ;;  %v46_v24 = vld [vmem:[#allocation2 + $0x68] sm:$0xff] }
  0x19   :  { %124 = vperm.xlu0 %236, %v120_v12   ;;  %v220_v22 = vpack.c.bf16 %v44_v21, %v43_v20  ;;  %v223_v25 = vpack.c.bf16 %v46_v24, %v45_v23  ;;  %v47_v26 = vld [vmem:[#allocation2 + $0x70] sm:$0xff]  ;;  %v48_v27 = vld [vmem:[#allocation2 + $0x78] sm:$0xff]  ;;  %v32_v29 = vld [vmem:[%s351_s0] sm:$0xff]  ;;  %p266_p11 = por %p265_p10, %p264_p9 }
  0x1a   :  { %v226_v28 = vpack.c.bf16 %v48_v27, %v47_v26  ;;  %v151_v32 = vld [vmem:[%s354_s3] ss:$0 sm:$0xff] }
  0x1b   :  { %209 = vmatpush3.bf16.msra.mxu0 %v208_v8  ;;  %p267_p12 = pnand %p266_p11, %p260_p8 }
  0x1c   :  { %210 = vmatprep.subr.bf16.mxu0 %v288_v0 }
  0x1f   :  { %212 = vmatpush3.bf16.msra.mxu0 %v211_v13 }
  0x20   :  { %213 = vmatprep.subr.bf16.mxu0 %v288_v0 }
  0x23   :  { %215 = vmatpush3.bf16.msra.mxu0 %v214_v16 }
  0x24   :  { %216 = vmatprep.subr.bf16.mxu0 %v288_v0 }
  0x27   :  { %218 = vmatpush3.bf16.msra.mxu0 %v217_v19 }
  0x28   :  { %219 = vmatprep.subr.bf16.mxu0 %v288_v0 }
  0x2b   :  { %221 = vmatpush3.bf16.msra.mxu0 %v220_v22 }
  0x2c   :  { %222 = vmatprep.subr.bf16.mxu0 %v288_v0 }
  0x2f   :  { %224 = vmatpush3.bf16.msra.mxu0 %v223_v25 }
  0x30   :  { %225 = vmatprep.subr.bf16.mxu0 %v288_v0 }
  0x33   :  { %227 = vmatpush3.bf16.msra.mxu0 %v226_v28 }
  0x36   :  { %202 = vmatmul.mubr.f32.vlgmr.msra.gmra.mrb[0].mxu0 %v32_v29 }
  0x98   :  { %v125_v30 = vpop.permute.xlu0 %124 }
 0x109   :  { %v115_v31 = vpop.f32.mrb[0].mxu0 }
 0x10a   :  { %v127_v33 = vmul.f32 %v125_v30, %v115_v31  ;;  %v203_v34 = vpop.f32.mrb[1].mxu0 }
 0x10c   :  { %v134_v35 = vmul.f32 %v151_v32, %v127_v33 }
 0x10e   :  { %135 = vst [vmem:[#allocation5] sm:$0xff] %v134_v35 }
 0x10f   :  { %270 = shalt.err (!%p267_p12)
}
 0x110   :  { %s271_s11 = scalar_lea.hbm %s355_s4, 128 }
 0x111   :  { %p272_p13 = scmp.ne.s32.totalorder %s355_s4, %s271_s11  ;;  %p275_p0 = scmp.lt.u32.totalorder %s271_s11, %s355_s4 }
 0x113   :  { %p277_p1 = pnand %p275_p0, %p272_p13 }
 0x115   :  { %280 = shalt.err (!%p277_p1)
}
 0x116   :  { %145 = dma.vmem_to_hbm [thread:$0]  %s143_s8, 128, %s355_s4, [#allocation4]  }
 0x117   :  { %283 = dma.done.wait [#allocation4], 128  }
 0x118   :  { %284 = vsyncadd [#allocation4], 4294967168 }
 0x119   :  { %149 = vsyncpa [#allocation3], 1 }
 0x11a   :  { %150 = vsyncpa [#allocation4], 1 }

</bundles_post_ra>
